<compile_context>
chip_gen: v6e
topology: v6e:2x2x1
jax: 0.10.0
libtpu: 0.0.40
codegen_flags: <defaults>
</compile_context>

<pallas_src>
import jax
import jax.numpy as jnp
from jax.experimental import pallas as pl
from jax.experimental.pallas import tpu as pltpu


# ---------------------------------------------------------------------------
# Kernel
# ---------------------------------------------------------------------------

def _layer_scale_kernel(x_ref, g_ref, o_ref):
    # x_ref: (tile_rows, D) block in x.dtype
    # g_ref: (1, D) resident block in the COMPUTE dtype (f32 on force_fp32)
    # o_ref: (tile_rows, D) block in the output dtype
    # (1, D) broadcasts over rows on the VPU; cast up, multiply, cast back.
    x = x_ref[...].astype(g_ref.dtype)
    o_ref[...] = (x * g_ref[...]).astype(o_ref.dtype)


# ---------------------------------------------------------------------------
# VMEM budget / tiling heuristics
# ---------------------------------------------------------------------------

_FALLBACK_TILE_BUDGET = 32 * 1024 * 1024   # safe on every generation
_FALLBACK_VMEM_LIMIT = 48 * 1024 * 1024

_BUDGET_CACHE = None


def _vmem_budgets():
    """(pipelined-buffer budget, scoped vmem limit) derived from the chip."""
    global _BUDGET_CACHE
    if _BUDGET_CACHE is not None:
        return _BUDGET_CACHE
    cap = None
    try:
        cap = getattr(pltpu.get_tpu_info(), "vmem_capacity_bytes", None)
    except Exception:
        cap = None
    if cap is None:
        budgets = (_FALLBACK_TILE_BUDGET, _FALLBACK_VMEM_LIMIT)
    elif cap >= 96 * 1024 * 1024:
        # 128 MiB parts (v5e / v6e): big tiles, step overhead fully amortized.
        budgets = (64 * 1024 * 1024, 96 * 1024 * 1024)
    else:
        # 64 MiB-per-TC parts (v7x): ~11-12 MiB per pipelined buffer keeps the
        # ~0.35 us/step overhead at ~4% while leaving headroom under 64 MiB.
        budgets = (44 * 1024 * 1024, 56 * 1024 * 1024)
    _BUDGET_CACHE = budgets
    return budgets


def _round_down(x, m):
    return max(m, (x // m) * m)


def _round_up(x, m):
    return ((x + m - 1) // m) * m


def _row_align(itemsize):
    # Sublane packing: 8 rows for 4-byte dtypes, 16 for 2-byte, 32 for 1-byte.
    return max(8, 32 // max(int(itemsize), 1))


def _choose_tile_rows(n_rows, d, x_itemsize, out_itemsize, budget):
    align = max(_row_align(x_itemsize), _row_align(out_itemsize))
    # 2 double-buffered input tiles + 2 double-buffered output tiles.
    bytes_per_row = 2 * d * (int(x_itemsize) + int(out_itemsize))
    tile = budget // max(bytes_per_row, 1)
    tile = _round_down(tile, align)
    tile = min(tile, _round_up(max(n_rows, 1), align))
    # Keep >= 2 grid steps (and an even count when cheap) so the row axis can
    # be split across both v7x TensorCores.
    if n_rows > 2 * align:
        grid = pl.cdiv(n_rows, tile)
        if grid < 2 or (grid % 2):
            target = max(2, grid + (grid % 2))
            tile2 = _round_up(pl.cdiv(n_rows, target), align)
            if pl.cdiv(n_rows, tile2) >= 2:
                tile = min(tile, tile2)
    return max(tile, align)


# ---------------------------------------------------------------------------
# Wrapper
# ---------------------------------------------------------------------------

def layer_scale(x, gamma, *, force_fp32=False, inplace=False,
                tile_rows=None, donate_x=False):
    """out = x * gamma (gamma broadcast along the last axis), LayerScale.forward.

    force_fp32: multiply in float32, cast back to x.dtype (torch path).
    inplace:    mirrors torch's `x.mul_(gamma)` dtype behavior (stay in
                x.dtype); otherwise the non-force_fp32 path type-promotes to
                result_type(x.dtype, gamma.dtype), exactly like `x * gamma`.
    donate_x:   alias the output onto x's buffer (only taken when dtypes match).
    """
    orig_shape = x.shape
    D = orig_shape[-1]

    gamma = jnp.asarray(gamma).reshape(-1)
    if gamma.shape[0] != D:
        raise ValueError(f"gamma has {gamma.shape[0]} elements, expected dim={D}")

    if force_fp32:
        out_dtype = x.dtype
        compute_dtype = jnp.float32
    elif inplace:
        out_dtype = x.dtype
        compute_dtype = x.dtype
    else:
        out_dtype = jnp.result_type(x.dtype, gamma.dtype)
        compute_dtype = out_dtype

    g2 = gamma.astype(compute_dtype).reshape(1, D)

    x2 = x.reshape(-1, D)
    R = x2.shape[0]
    x_itemsize = jnp.dtype(x.dtype).itemsize
    out_itemsize = jnp.dtype(out_dtype).itemsize
    tile_budget, vmem_limit = _vmem_budgets()

    if tile_rows is None:
        tile_rows = _choose_tile_rows(R, D, x_itemsize, out_itemsize, tile_budget)
    else:
        align = max(_row_align(x_itemsize), _row_align(out_itemsize))
        tile_rows = _round_down(int(tile_rows), align)

    grid = pl.cdiv(R, tile_rows)   # partial last block handled by Pallas

    call_kwargs = {}
    if donate_x and out_dtype == x.dtype:
        # Output shares shape/dtype with x2 -> alias to avoid an extra (R, D)
        # HBM allocation around the custom call.
        call_kwargs["input_output_aliases"] = {0: 0}

    cost = pl.CostEstimate(
        flops=R * D,
        transcendentals=0,
        bytes_accessed=R * D * (x_itemsize + out_itemsize) + D * out_itemsize,
    )

    out = pl.pallas_call(
        _layer_scale_kernel,
        out_shape=jax.ShapeDtypeStruct((R, D), out_dtype),
        grid_spec=pltpu.PrefetchScalarGridSpec(
            num_scalar_prefetch=0,
            grid=(grid,),
            in_specs=[
                pl.BlockSpec((tile_rows, D), lambda i: (i, 0)),
                pl.BlockSpec((1, D), lambda i: (0, 0)),   # resident gamma tile
            ],
            out_specs=pl.BlockSpec((tile_rows, D), lambda i: (i, 0)),
        ),
        compiler_params=pltpu.CompilerParams(
            dimension_semantics=("parallel",),
            vmem_limit_bytes=vmem_limit,
        ),
        cost_estimate=cost,
        **call_kwargs,
    )(x2, g2)

    return out.reshape(orig_shape[:-1] + (D,)).astype(out_dtype)


# ---------------------------------------------------------------------------
# Self-test
# ---------------------------------------------------------------------------

if __name__ == "__main__":
    # Module config: dim = hidden size; init_values = 1e-5 (as in __init__).
    B, N, D = 2, 8, 32
    init_values = 1e-5

    key = jax.random.PRNGKey(0)
    x = jax.random.normal(key, (B, N, D), dtype=jnp.float32)
    gamma = init_values * jnp.ones((D,), dtype=jnp.float32)  # nn.Parameter
    ref = x * gamma

    # 1) Default path (auto tile), f32.
    out = jax.block_until_ready(layer_scale(x, gamma))
    assert out.dtype == jnp.float32
    assert jnp.allclose(out, ref, atol=1e-6, rtol=1e-6)

    # 2) force_fp32 path.
    out32 = jax.block_until_ready(layer_scale(x, gamma, force_fp32=True))
    assert jnp.allclose(out32, ref, atol=1e-6, rtol=1e-6)

    # 3) Multi-step grid with a ragged row count (exercises the partial last
    #    block instead of the removed pad/slice path).
    xr = jax.random.normal(jax.random.PRNGKey(1), (3, 5, D), dtype=jnp.float32)
    out_r = jax.block_until_ready(layer_scale(xr, gamma, tile_rows=8))
    assert jnp.allclose(out_r, xr * gamma, atol=1e-6, rtol=1e-6)

    # 4) bf16 activations, inplace=True: stays bf16 (torch `x.mul_(gamma)`).
    xb = x.astype(jnp.bfloat16)
    out_bi = jax.block_until_ready(layer_scale(xb, gamma, inplace=True))
    assert out_bi.dtype == jnp.bfloat16
    ref_bi = xb * gamma.astype(jnp.bfloat16)
    assert jnp.allclose(out_bi.astype(jnp.float32), ref_bi.astype(jnp.float32),
                        atol=1e-6, rtol=1e-2)

    # 5) bf16, non-inplace: type-promotes to f32 (torch `x * gamma`).
    out_bp = jax.block_until_ready(layer_scale(xb, gamma))
    assert out_bp.dtype == jnp.float32
    ref_bp = xb.astype(jnp.float32) * gamma
    assert jnp.allclose(out_bp, ref_bp, atol=1e-6, rtol=1e-2)

    # 6) bf16, force_fp32: compute in f32, cast back to bf16.
    out_bf = jax.block_until_ready(layer_scale(xb, gamma, force_fp32=True))
    assert out_bf.dtype == jnp.bfloat16
    ref_bf = (xb.astype(jnp.float32) * gamma).astype(jnp.bfloat16)
    assert jnp.allclose(out_bf.astype(jnp.float32), ref_bf.astype(jnp.float32),
                        atol=1e-6, rtol=1e-2)

    print("KERNEL_OK")
</pallas_src>

<mosaic_0001>
module attributes {stable_mosaic.version = 11 : i64} {
  func.func @_layer_scale_kernel(%arg0: i32, %arg1: memref<16x32xf32, #tpu.memory_space<vmem>>, %arg2: memref<1x32xf32, #tpu.memory_space<vmem>>, %arg3: memref<16x32xf32, #tpu.memory_space<vmem>>) attributes {dimension_semantics = [#tpu.dimension_semantics<parallel>], iteration_bounds = array<i64: 1>, scalar_prefetch = 0 : i64, scratch_operands = 0 : i64, tpu.core_type = #tpu.core_type<tc>, window_params = [{transform_indices = @transform_0, window_bounds = array<i64: 16, 32>}, {pipeline_mode = #tpu.pipeline_mode<synchronous>, transform_indices = @transform_1, window_bounds = array<i64: 1, 32>}, {transform_indices = @transform_2, window_bounds = array<i64: 16, 32>}]} {
    %c0 = arith.constant 0 : index
    %c0_0 = arith.constant 0 : index
    %0 = vector.load %arg1[%c0, %c0_0] : memref<16x32xf32, #tpu.memory_space<vmem>>, vector<16x32xf32>
    %c0_1 = arith.constant 0 : index
    %c0_2 = arith.constant 0 : index
    %1 = vector.load %arg2[%c0_1, %c0_2] : memref<1x32xf32, #tpu.memory_space<vmem>>, vector<1x32xf32>
    %2 = vector.broadcast %1 : vector<1x32xf32> to vector<16x32xf32>
    %3 = arith.mulf %0, %2 : vector<16x32xf32>
    %c0_3 = arith.constant 0 : index
    %c0_4 = arith.constant 0 : index
    %4 = vector.load %arg3[%c0_3, %c0_4] : memref<16x32xf32, #tpu.memory_space<vmem>>, vector<16x32xf32>
    tpu.vector_store %arg3[%c0_3, %c0_4], %3 {strides = array<i32>} : memref<16x32xf32, #tpu.memory_space<vmem>>, vector<16x32xf32>,
    return
  }
  func.func @transform_0(%arg0: i32) -> (i32, i32) {
    %c0_i32 = arith.constant 0 : i32
    %c0_i32_0 = arith.constant 0 : i32
    return %arg0, %c0_i32 : i32, i32
  }
  func.func @transform_1(%arg0: i32) -> (i32, i32) {
    %c0_i32 = arith.constant 0 : i32
    %c0_i32_0 = arith.constant 0 : i32
    %c0_i32_1 = arith.constant 0 : i32
    return %c0_i32, %c0_i32_0 : i32, i32
  }
  func.func @transform_2(%arg0: i32) -> (i32, i32) {
    %c0_i32 = arith.constant 0 : i32
    %c0_i32_0 = arith.constant 0 : i32
    return %arg0, %c0_i32 : i32, i32
  }
}

</mosaic_0001>

<bundles_post_ra>
// kernel: tpu_custom_call.1
= control target key start
LH: loop header
LB: loop body
LE: loop exit
PB: predicated region body
PF: predicated region fallthrough
CT: control target
= control target key end

     0   :  { %7 = vsyncpa [#allocation3], 0  ;;  %s134_s0 = inlined_call_operand.hbm [shape: f32[16,32], index: 0, kind: input, shape index: {}]   ;;  %s135_s1 = inlined_call_operand.vmem [shape: f32[1,32], index: 1, kind: input, shape index: {}]   ;;  %s136_s2 = inlined_call_operand.hbm [shape: f32[16,32], index: 2, kind: output, shape index: {}]  }
   0x1   :  { %8 = vsyncpa [#allocation4], 0  ;;  %s106_s9 = smov [#allocation2]  }
   0x2   :  { %s14_s10 = sshll.u32 %s106_s9, 4  ;;  %s15_s10 = int_to_ptr.vmem [resolvable:$true] %s14_s10 }
   0x3   :  { %s70_s11 = scalar_lea.vmem %s15_s10, 256  ;;  %p75_p1 = scmp.lt.s32.totalorder %s15_s10, %s15_s10 }
   0x4   :  { %p71_p0 = scmp.ne.s32.totalorder %s15_s10, %s70_s11  ;;  %p76_p2 = scmp.lt.s32.totalorder %s70_s11, %s70_s11 }
   0x6   :  { %p77_p3 = por %p76_p2, %p75_p1 }
   0x8   :  { %p78_p4 = pnand %p77_p3, %p71_p0 }
   0xa   :  { %81 = shalt.err (!%p78_p4)
}
   0xb   :  { %s107_s12 = smov 128   ;;  %s108_s13 = smov 8  }
   0xc   :  { %20 = dma.hbm_to_vmem [thread:$0]  %s134_s0, 256, %s15_s10, [#allocation3], %s107_s12, %s107_s12, %s108_s13  }
   0xd   :  { %102 = dma.done.wait [#allocation3], 256  }
   0xe   :  { %103 = vsyncadd [#allocation3], 4294967040  ;;  %s109_s16 = smov [#allocation5]   ;;  %v26_v0 = vld [vmem:[#allocation2] sm:$0xff]  ;;  %vm37_vm0 = vcmask 261120   ;;  %v27_v2 = vld [vmem:[#allocation2 + $0x8] sm:$0xff] }
   0xf   :  { %s45_s17 = sshll.u32 %s109_s16, 4  ;;  %v57_v1 = vld [vmem:[%s135_s1] ss:$0 sm:$0xff]  ;;  %s46_s17 = int_to_ptr.vmem [resolvable:$true] %s45_s17 }
  0x10   :  { %v35_v3 = vmul.f32 %v57_v1, %v26_v0  ;;  %v36_v4 = vmul.f32 %v57_v1, %v27_v2  ;;  %s82_s20 = scalar_lea.vmem %s46_s17, 256  ;;  %p87_p6 = scmp.lt.s32.totalorder %s46_s17, %s46_s17 }
  0x11   :  { %p83_p5 = scmp.ne.s32.totalorder %s46_s17, %s82_s20  ;;  %p88_p7 = scmp.lt.s32.totalorder %s82_s20, %s82_s20 }
  0x12   :  { %38 = vst.msk [vmem:[#allocation5] sm:$0xff] %vm37_vm0, %v35_v3  ;;  %39 = vst.msk [vmem:[#allocation5 + $0x8] sm:$0xff] %vm37_vm0, %v36_v4 }
  0x13   :  { %p89_p8 = por %p88_p7, %p87_p6 }
  0x15   :  { %p90_p9 = pnand %p89_p8, %p83_p5 }
  0x17   :  { %93 = shalt.err (!%p90_p9)
}
  0x18   :  { %51 = dma.vmem_to_hbm [thread:$0]  %s46_s17, 256, %s136_s2, [#allocation4], %s107_s12, %s107_s12, %s108_s13  }
  0x19   :  { %104 = dma.done.wait [#allocation4], 256  }
  0x1a   :  { %105 = vsyncadd [#allocation4], 4294967040 }
  0x1b   :  { %55 = vsyncpa [#allocation3], 1 }
  0x1c   :  { %56 = vsyncpa [#allocation4], 1 }

</bundles_post_ra>
